<compile_context>
chip_gen: v7x
topology: tpu7x:2x2x1
jax: 0.10.0
libtpu: 0.0.40
codegen_flags: <defaults>
</compile_context>

<pallas_src>
import jax
import jax.numpy as jnp
from jax import lax
from jax.experimental import pallas as pl
from jax.experimental.pallas import tpu as pltpu


def _segmenter_kernel(x_ref, w_ref, b_ref, o_ref):
    # x_ref: (tile_m, H) VMEM   w_ref: (1, H) VMEM
    # b_ref: (1,) SMEM (f32)    o_ref: (1, 1, tile_m) VMEM (lane-dense)
    acc = lax.dot_general(
        w_ref[...], x_ref[...],
        dimension_numbers=(((1,), (1,)), ((), ())),   # contract on H (trans_b)
        preferred_element_type=jnp.float32,
    )                                                 # (1, tile_m)
    o_ref[0] = (acc + b_ref[0]).astype(o_ref.dtype)


def _choose_tile_m(M, hidden, dtype):
    """Pick a row tile: big enough to hide per-step overhead, small enough
    that the double-buffered x block fits comfortably in VMEM on all gens."""
    itemsize = jnp.dtype(dtype).itemsize
    padded_h = pl.cdiv(hidden, 128) * 128          # VMEM pads lanes to 128
    bytes_per_row = padded_h * itemsize
    target_bytes = 4 * 1024 * 1024                 # ~4 MiB per buffer
    tile = target_bytes // bytes_per_row
    tile = max(256, (tile // 256) * 256)           # lane-dense out, bf16 sublanes
    m_rounded = pl.cdiv(M, 128) * 128
    tile = min(tile, max(128, m_rounded))          # don't over-pad tiny inputs
    # Keep >= 2 grid steps when there's enough work so the "parallel" axis can
    # be sharded across both TensorCores on v7x.
    if pl.cdiv(M, tile) == 1 and M > 2 * 128:
        tile = max(128, pl.cdiv(pl.cdiv(M, 2), 128) * 128)
    return int(tile)


def segmenter_forward(feats, w, b, *, tile_m=None):
    """feats = (state_feats, _);  returns predict(state_feats).squeeze(-1)."""
    state_feats, _ = feats
    orig_shape = state_feats.shape                 # (..., hidden)
    hidden = orig_shape[-1]
    dtype = state_feats.dtype

    x2d = state_feats.reshape(-1, hidden)          # (M, hidden)
    M = x2d.shape[0]

    if tile_m is None:
        tile_m = _choose_tile_m(M, hidden, dtype)

    num_tiles = pl.cdiv(M, tile_m)
    m_pad = num_tiles * tile_m
    if m_pad != M:
        x2d = jnp.pad(x2d, ((0, m_pad - M), (0, 0)))   # padded rows sliced off below

    w_row = w.reshape(1, hidden).astype(dtype)     # (1, H) lane-dense weight row
    b_smem = b.reshape(1).astype(jnp.float32)      # scalar bias -> SMEM

    itemsize = jnp.dtype(dtype).itemsize
    cost = pl.CostEstimate(
        flops=2 * m_pad * hidden,
        transcendentals=0,
        bytes_accessed=m_pad * hidden * itemsize + hidden * itemsize + 4
        + m_pad * itemsize,
    )

    out = pl.pallas_call(
        _segmenter_kernel,
        out_shape=jax.ShapeDtypeStruct((num_tiles, 1, tile_m), dtype),
        grid_spec=pltpu.PrefetchScalarGridSpec(
            num_scalar_prefetch=0,
            grid=(num_tiles,),
            in_specs=[
                pl.BlockSpec((tile_m, hidden), lambda i: (i, 0)),   # streamed x
                pl.BlockSpec((1, hidden), lambda i: (0, 0)),        # resident w
                pl.BlockSpec(memory_space=pltpu.MemorySpace.SMEM),  # bias scalar
            ],
            out_specs=pl.BlockSpec((1, 1, tile_m), lambda i: (i, 0, 0)),
        ),
        compiler_params=pltpu.CompilerParams(
            dimension_semantics=("parallel",),
            vmem_limit_bytes=32 * 1024 * 1024,
        ),
        cost_estimate=cost,
    )(x2d, w_row, b_smem)

    out_flat = out.reshape(m_pad)[:M]              # drop padding
    return out_flat.reshape(orig_shape[:-1])       # .squeeze(-1)


if __name__ == "__main__":
    # Small deterministic setup: batch=2, seq=8, hidden=32 (FLAGS.hidden_size).
    batch, seq, hidden = 2, 8, 32
    key = jax.random.PRNGKey(0)
    k_x, k_w, k_b = jax.random.split(key, 3)

    state_feats = jax.random.normal(k_x, (batch, seq, hidden), dtype=jnp.float32)
    other_feats = None  # second element of the feats tuple is unused

    # nn.Linear(hidden, 1) parameters, deterministic (PyTorch-style uniform init).
    bound = 1.0 / jnp.sqrt(hidden)
    w = jax.random.uniform(k_w, (1, hidden), minval=-bound, maxval=bound,
                           dtype=jnp.float32)
    b = jax.random.uniform(k_b, (1,), minval=-bound, maxval=bound,
                           dtype=jnp.float32)

    out = segmenter_forward((state_feats, other_feats), w, b)
    out = jax.block_until_ready(out)

    # Reference check against plain JAX.
    ref = (state_feats @ w.T + b).squeeze(-1)
    assert out.shape == (batch, seq), out.shape
    assert jnp.allclose(out, ref, atol=1e-5, rtol=1e-5), "mismatch vs reference"

    # Also exercise a ragged / larger case to validate padding + multi-tile grid.
    big = jax.random.normal(k_x, (3, 777, hidden), dtype=jnp.float32)
    out_big = jax.block_until_ready(segmenter_forward((big, None), w, b))
    ref_big = (big @ w.T + b).squeeze(-1)
    assert out_big.shape == (3, 777), out_big.shape
    assert jnp.allclose(out_big, ref_big, atol=1e-5, rtol=1e-5), "mismatch (ragged)"

    print("KERNEL_OK")
</pallas_src>

<mosaic_0001>
module attributes {stable_mosaic.version = 11 : i64} {
  func.func @_segmenter_kernel(%arg0: i32, %arg1: memref<128x32xf32, #tpu.memory_space<vmem>>, %arg2: memref<1x32xf32, #tpu.memory_space<vmem>>, %arg3: memref<1xf32, #tpu.memory_space<smem>>, %arg4: memref<1x1x128xf32, #tpu.memory_space<vmem>>) attributes {dimension_semantics = [#tpu.dimension_semantics<parallel>], iteration_bounds = array<i64: 1>, scalar_prefetch = 0 : i64, scratch_operands = 0 : i64, tpu.core_type = #tpu.core_type<tc>, window_params = [{transform_indices = @transform_0, window_bounds = array<i64: 128, 32>}, {pipeline_mode = #tpu.pipeline_mode<synchronous>, transform_indices = @transform_1, window_bounds = array<i64: 1, 32>}, {transform_indices = @transform_2, window_bounds = array<i64: 1>}, {transform_indices = @transform_3, window_bounds = array<i64: 1, 1, 128>}]} {
    %c0 = arith.constant 0 : index
    %c0_0 = arith.constant 0 : index
    %0 = vector.load %arg2[%c0, %c0_0] : memref<1x32xf32, #tpu.memory_space<vmem>>, vector<1x32xf32>
    %c0_1 = arith.constant 0 : index
    %c0_2 = arith.constant 0 : index
    %1 = vector.load %arg1[%c0_1, %c0_2] : memref<128x32xf32, #tpu.memory_space<vmem>>, vector<128x32xf32>
    %cst = arith.constant dense<0.000000e+00> : vector<1x128xf32>
    %2 = tpu.matmul %0, %1, %cst {dimension_numbers = #tpu.dot_dimension_numbers<[1], [1], [0], [0], [0, 0, 1, 0], [], []>} : vector<1x32xf32>, vector<128x32xf32>, vector<1x128xf32> -> vector<1x128xf32>
    %c0_3 = arith.constant 0 : index
    %3 = memref.load %arg3[%c0_3] : memref<1xf32, #tpu.memory_space<smem>>
    %4 = vector.broadcast %3 : f32 to vector<1x128xf32>
    %5 = arith.addf %2, %4 : vector<1x128xf32>
    %c0_4 = arith.constant 0 : index
    %c0_5 = arith.constant 0 : index
    %c0_6 = arith.constant 0 : index
    %6 = vector.load %arg4[%c0_4, %c0_5, %c0_6] : memref<1x1x128xf32, #tpu.memory_space<vmem>>, vector<1x1x128xf32>
    %7 = vector.shape_cast %6 : vector<1x1x128xf32> to vector<1x128xf32>
    %8 = vector.shape_cast %5 : vector<1x128xf32> to vector<1x1x128xf32>
    tpu.vector_store %arg4[%c0_4, %c0_5, %c0_6], %8 {strides = array<i32>} : memref<1x1x128xf32, #tpu.memory_space<vmem>>, vector<1x1x128xf32>,
    return
  }
  func.func @transform_0(%arg0: i32) -> (i32, i32) {
    %c0_i32 = arith.constant 0 : i32
    %c0_i32_0 = arith.constant 0 : i32
    return %arg0, %c0_i32 : i32, i32
  }
  func.func @transform_1(%arg0: i32) -> (i32, i32) {
    %c0_i32 = arith.constant 0 : i32
    %c0_i32_0 = arith.constant 0 : i32
    %c0_i32_1 = arith.constant 0 : i32
    return %c0_i32, %c0_i32_0 : i32, i32
  }
  func.func @transform_2(%arg0: i32) -> i32 {
    %c0_i32 = arith.constant 0 : i32
    %c0_i32_0 = arith.constant 0 : i32
    return %c0_i32 : i32
  }
  func.func @transform_3(%arg0: i32) -> (i32, i32, i32) {
    %c0_i32 = arith.constant 0 : i32
    %c0_i32_0 = arith.constant 0 : i32
    %c0_i32_1 = arith.constant 0 : i32
    return %arg0, %c0_i32, %c0_i32_0 : i32, i32, i32
  }
}

</mosaic_0001>

<bundles_post_ra>
// kernel: tpu_custom_call.1
= control target key start
LH: loop header
LB: loop body
LE: loop exit
PB: predicated region body
PF: predicated region fallthrough
CT: control target
= control target key end

     0   :  { %vm35_vm0 = vcmask 261120   ;;  %v301_v2 = vmov 0.0|0.0   ;;  %vm302_vm2 = vmmov 0   ;;  %v303_v5 = vmov 0.0   ;;  %s414_s0 = inlined_call_operand.vmem [shape: f32[128,32], index: 0, kind: input, shape index: {}]   ;;  %s415_s1 = inlined_call_operand.vmem [shape: f32[1,32], index: 1, kind: input, shape index: {}]   ;;  %s416_s2 = inlined_call_operand.<no memory space> [shape: f32[1], index: 2, kind: input, shape index: {}]   ;;  %s417_s3 = inlined_call_operand.hbm [shape: f32[1,1,128], index: 3, kind: output, shape index: {}]  }
   0x1   :  { %v17_v0 = vld [vmem:[%s414_s0] sm:$0xff]  ;;  %v18_v1 = vld [vmem:[%s414_s0 + $0x8] sm:$0xff]  ;;  %241 = vmatprep.subr.bf16.mxu0 %v301_v2  ;;  %vm333_vm1 = vmpackc.low %vm35_vm0, %vm35_vm0  ;;  %238 = vmatprep.mubr.msk.f32.mxu0 %vm302_vm2, %v303_v5 }
   0x2   :  { %v242_v3 = vpack.c.bf16 %v18_v1, %v17_v0  ;;  %v19_v6 = vld [vmem:[%s414_s0 + $0x10] sm:$0xff]  ;;  %v20_v7 = vld [vmem:[%s414_s0 + $0x18] sm:$0xff] }
   0x4   :  { %244 = vmatpush3.bf16.xpose.msk.msra.mxu0 %vm333_vm1, %v242_v3 }
   0x5   :  { %245 = vmatprep.subr.bf16.mxu0 %v301_v2 }
   0x6   :  { %9 = vsyncpa [#allocation4], 0  ;;  %v246_v8 = vpack.c.bf16 %v20_v7, %v19_v6  ;;  %v21_v9 = vld [vmem:[%s414_s0 + $0x20] sm:$0xff]  ;;  %v22_v10 = vld [vmem:[%s414_s0 + $0x28] sm:$0xff]  ;;  %v34_v28 = vstv %s416_s2  ;;  %s304_s21 = smov [#allocation3]  }
   0x7   :  { %v250_v11 = vpack.c.bf16 %v22_v10, %v21_v9  ;;  %v23_v12 = vld [vmem:[%s414_s0 + $0x30] sm:$0xff]  ;;  %v24_v13 = vld [vmem:[%s414_s0 + $0x38] sm:$0xff]  ;;  %v25_v15 = vld [vmem:[%s414_s0 + $0x40] sm:$0xff]  ;;  %s164_s22 = sshll.u32 %s304_s21, 4  ;;  %s165_s22 = int_to_ptr.vmem [resolvable:$true] %s164_s22 }
   0x8   :  { %v254_v14 = vpack.c.bf16 %v24_v13, %v23_v12  ;;  %v26_v16 = vld [vmem:[%s414_s0 + $0x48] sm:$0xff]  ;;  %v27_v18 = vld [vmem:[%s414_s0 + $0x50] sm:$0xff]  ;;  %v28_v19 = vld [vmem:[%s414_s0 + $0x58] sm:$0xff]  ;;  %s281_s23 = scalar_lea.vmem %s165_s22, 32  ;;  %p282_p1 = scmp.lt.s32.totalorder %s165_s22, %s165_s22 }
   0x9   :  { %v258_v17 = vpack.c.bf16 %v26_v16, %v25_v15  ;;  %v262_v20 = vpack.c.bf16 %v28_v19, %v27_v18  ;;  %v29_v21 = vld [vmem:[%s414_s0 + $0x60] sm:$0xff]  ;;  %v30_v22 = vld [vmem:[%s414_s0 + $0x68] sm:$0xff]  ;;  %v31_v24 = vld [vmem:[%s414_s0 + $0x70] sm:$0xff] }
   0xa   :  { %v266_v23 = vpack.c.bf16 %v30_v22, %v29_v21  ;;  %v32_v25 = vld [vmem:[%s414_s0 + $0x78] sm:$0xff]  ;;  %v16_v27 = vld [vmem:[%s415_s1] sm:$0x1]  ;;  %s277_s0 = scalar_lea.vmem %s165_s22, 16 }
   0xb   :  { %v270_v26 = vpack.c.bf16 %v32_v25, %v31_v24  ;;  %p278_p0 = scmp.ne.s32.totalorder %s165_s22, %s277_s0  ;;  %p283_p2 = scmp.lt.s32.totalorder %s281_s23, %s277_s0 }
   0xc   :  { %248 = vmatpush3.bf16.xpose.msk.msra.mxu0 %vm333_vm1, %v246_v8 }
   0xd   :  { %249 = vmatprep.subr.bf16.mxu0 %v301_v2  ;;  %p284_p3 = por %p283_p2, %p282_p1 }
   0xf   :  { %p285_p4 = pnand %p284_p3, %p278_p0 }
  0x14   :  { %252 = vmatpush3.bf16.xpose.msk.msra.mxu0 %vm333_vm1, %v250_v11 }
  0x15   :  { %253 = vmatprep.subr.bf16.mxu0 %v301_v2 }
  0x1c   :  { %256 = vmatpush3.bf16.xpose.msk.msra.mxu0 %vm333_vm1, %v254_v14 }
  0x1d   :  { %257 = vmatprep.subr.bf16.mxu0 %v301_v2 }
  0x24   :  { %260 = vmatpush3.bf16.xpose.msk.msra.mxu0 %vm333_vm1, %v258_v17 }
  0x25   :  { %261 = vmatprep.subr.bf16.mxu0 %v301_v2 }
  0x2c   :  { %264 = vmatpush3.bf16.xpose.msk.msra.mxu0 %vm333_vm1, %v262_v20 }
  0x2d   :  { %265 = vmatprep.subr.bf16.mxu0 %v301_v2 }
  0x34   :  { %268 = vmatpush3.bf16.xpose.msk.msra.mxu0 %vm333_vm1, %v266_v23 }
  0x35   :  { %269 = vmatprep.subr.bf16.mxu0 %v301_v2 }
  0x3c   :  { %272 = vmatpush3.bf16.xpose.msk.msra.mxu0 %vm333_vm1, %v270_v26 }
  0x43   :  { %239 = vmatmul.mubr.msk.f32.vlgmr.msra.gmra.mrb[0].mxu0 %vm35_vm0, %v16_v27 }
 0x116   :  { %v153_v29 = vpop.f32.mrb[0].mxu0 }
 0x117   :  { %v154_v30 = vadd.f32 %v153_v29, %v34_v28  ;;  %v240_v31 = vpop.f32.mrb[1].mxu0 }
 0x119   :  { %157 = vst [vmem:[#allocation3] sm:$0x1] %v154_v30 }
 0x11a   :  { %288 = shalt.err (!%p285_p4)
}
 0x11b   :  { %s289_s25 = scalar_lea.hbm %s417_s3, 16 }
 0x11c   :  { %p290_p5 = scmp.ne.s32.totalorder %s417_s3, %s289_s25  ;;  %p293_p6 = scmp.lt.u32.totalorder %s289_s25, %s417_s3 }
 0x11e   :  { %p295_p7 = pnand %p293_p6, %p290_p5 }
 0x120   :  { %298 = shalt.err (!%p295_p7)
}
 0x121   :  { %167 = dma.vmem_to_hbm [thread:$0]  %s165_s22, 16, %s417_s3, [#allocation4]  }
 0x122   :  { %299 = dma.done.wait [#allocation4], 16  }
 0x123   :  { %300 = vsyncadd [#allocation4], 4294967280 }
 0x124   :  { %171 = vsyncpa [#allocation4], 1 }

</bundles_post_ra>
